<compile_context>
chip_gen: v6e
topology: v6e:2x2x1
jax: 0.10.0
libtpu: 0.0.40
codegen_flags: <defaults>
</compile_context>

<pallas_src>
import functools

import jax
import jax.numpy as jnp
import numpy as np
from jax.experimental import pallas as pl
from jax.experimental.pallas import tpu as pltpu

GAUSSIAN_STEPS = {1: 1.596, 2: 0.996, 3: 0.586, 4: 0.336}


def _round_up(x, m):
    return (x + m - 1) // m * m


# ---------------------------------------------------------------------------
# Kernel: stage the KH*KW shifted lane-slices of B_tile padded images into a
# stacked-K scratch, then one (Cout, K) @ (K, B_tile*L_out) MXU matmul.
#   w_ref  : VMEM (Cout, KH*KW*Cin)      mixed quantized weight (resident)
#   x_ref  : VMEM (B_tile, Cin, L_x)     zero-padded, flattened images
#   o_ref  : VMEM (B_tile, Cout, L_out)  lane-dense output tile (f32)
#   xk_ref : VMEM (KH*KW*Cin, B_tile*L_out) scratch RHS (compute dtype)
# ---------------------------------------------------------------------------
def _conv_kernel(KH, KW, Wp, dh, dw, B_tile, L_out,
                 w_ref, x_ref, o_ref, xk_ref):
    cin = x_ref.shape[1]
    x_all = x_ref[...]                                   # (B_tile, Cin, L_x)

    # Stage shifted views: row block t*Cin holds tap t, lane block b*L_out
    # holds image b.  All offsets are static; unaligned lane starts cost XLU
    # rotates only (non-binding unit at these shapes).
    for t in range(KH * KW):                             # static, unrolled
        kh, kw = divmod(t, KW)
        off = kh * dh * Wp + kw * dw
        for b in range(B_tile):
            xk_ref[pl.ds(t * cin, cin), pl.ds(b * L_out, L_out)] = \
                x_all[b, :, off:off + L_out]

    # Single K = KH*KW*Cin matmul (f32 accumulation on the MXU).
    acc = jnp.dot(w_ref[...], xk_ref[...],
                  preferred_element_type=jnp.float32)    # (Cout, B_tile*L_out)

    for b in range(B_tile):                              # lane-dense stores
        o_ref[b, :, :] = acc[:, b * L_out:(b + 1) * L_out].astype(o_ref.dtype)


def shared_mix_quant_conv2d(x, weight, alpha_weight, bits,
                            stride=(1, 1), padding=(1, 1), dilation=(1, 1),
                            compute_dtype=jnp.bfloat16, b_tile=2):
    """Forward pass of SharedMixQuantConv2d (bias=False, groups=1)."""
    N, Cin, H, W = x.shape
    Cout, Cin_w, KH, KW = weight.shape
    assert Cin == Cin_w, "groups != 1 not supported"
    sh, sw_ = stride
    ph, pw = padding
    dh, dw = dilation

    # --- gaussian quantize + softmax mix of the weight (hoisted, f32) -------
    # Exactly the torch ordering: y = clip((round(w/step+.5)-.5)*step) * sw[i]
    sm = jax.nn.softmax(alpha_weight.astype(jnp.float32))
    w = weight.astype(jnp.float32)
    wstd = jnp.std(w, ddof=1)                 # torch .std() is unbiased
    # NOTE: torch would produce inf/NaN for a constant weight (std == 0);
    # this guard intentionally diverges for that degenerate case only.
    wstd = jnp.where(wstd > 0, wstd, 1.0)
    mix = jnp.zeros_like(w)
    for i, bit in enumerate(bits):
        step = GAUSSIAN_STEPS[bit] * wstd
        lvls = 2 ** bit / 2
        y = (jnp.round(w / step + 0.5) - 0.5) * step
        thr = (lvls - 0.5) * step
        y = jnp.clip(y, -thr, thr)
        mix = mix + y * sm[i]

    # --- geometry ------------------------------------------------------------
    Hp, Wp = H + 2 * ph, W + 2 * pw
    Ho = (H + 2 * ph - dh * (KH - 1) - 1) // sh + 1
    Wo = (W + 2 * pw - dw * (KW - 1) - 1) // sw_ + 1
    off_max = (KH - 1) * dh * Wp + (KW - 1) * dw
    L_out = _round_up(Hp * Wp, 128)            # lane-dense output width
    L_x = _round_up(L_out + off_max, 128)      # input width incl. shift halo

    # NCHW -> spatial zero-pad -> flatten each padded image onto the lane axis.
    xp = jnp.pad(x.astype(jnp.float32),
                 ((0, 0), (0, 0), (ph, ph), (pw, pw))).reshape(N, Cin, Hp * Wp)
    xp = jnp.pad(xp, ((0, 0), (0, 0), (0, L_x - Hp * Wp))).astype(compute_dtype)
    # TODO(synk): for production image sizes, fuse the lane/halo pad into the
    # kernel (pl.ANY input + make_async_copy into a zero-initialized VMEM
    # scratch) so x makes only one HBM pass; at 16x16 the wrapper pads are noise.

    # --- batch tiling: B_tile images per grid step ---------------------------
    b_tile = max(1, min(b_tile, N))
    if N % b_tile:
        xp = jnp.pad(xp, ((0, b_tile - N % b_tile), (0, 0), (0, 0)))
    Np = xp.shape[0]
    G = Np // b_tile

    # weight -> (Cout, KH*KW*Cin): row layout matches the stacked-K scratch.
    K = KH * KW * Cin
    w_k = mix.transpose(0, 2, 3, 1).reshape(Cout, K).astype(compute_dtype)

    kernel = functools.partial(_conv_kernel, KH, KW, Wp, dh, dw, b_tile, L_out)

    ce = pl.CostEstimate(
        flops=2 * Np * Cout * K * L_out,
        transcendentals=0,
        bytes_accessed=(xp.size * xp.dtype.itemsize
                        + w_k.size * w_k.dtype.itemsize
                        + Np * Cout * L_out * 4))

    out = pl.pallas_call(
        kernel,
        out_shape=jax.ShapeDtypeStruct((Np, Cout, L_out), jnp.float32),
        grid=(G,),
        in_specs=[
            pl.BlockSpec((Cout, K), lambda g: (0, 0)),            # resident weight
            pl.BlockSpec((b_tile, Cin, L_x), lambda g: (g, 0, 0)),  # B_tile images
        ],
        out_specs=pl.BlockSpec((b_tile, Cout, L_out), lambda g: (g, 0, 0)),
        scratch_shapes=[pltpu.VMEM((K, b_tile * L_out), compute_dtype)],
        compiler_params=pltpu.CompilerParams(
            dimension_semantics=("parallel",)),
        cost_estimate=ce,
    )(w_k, xp)

    # strip batch/lane padding, un-flatten, pick strided output positions.
    out = out[:N, :, :Hp * Wp].reshape(N, Cout, Hp, Wp)
    out = out[:, :, 0:(Ho - 1) * sh + 1:sh, 0:(Wo - 1) * sw_ + 1:sw_]
    return out


# ---------------------------------------------------------------------------
# Pure-JAX reference (same math as the torch module) used as correctness check.
# ---------------------------------------------------------------------------
def _reference(x, weight, alpha_weight, bits, stride, padding, dilation):
    sm = jax.nn.softmax(alpha_weight.astype(jnp.float32))
    w = weight.astype(jnp.float32)
    wstd = jnp.std(w, ddof=1)
    mix = jnp.zeros_like(w)
    for i, bit in enumerate(bits):
        step = GAUSSIAN_STEPS[bit] * wstd
        lvls = 2 ** bit / 2
        y = (jnp.round(w / step + 0.5) - 0.5) * step
        thr = (lvls - 0.5) * step
        y = jnp.clip(y, -thr, thr)
        mix = mix + y * sm[i]
    return jax.lax.conv_general_dilated(
        x.astype(jnp.float32), mix, window_strides=stride,
        padding=[(padding[0], padding[0]), (padding[1], padding[1])],
        rhs_dilation=dilation,
        dimension_numbers=("NCHW", "OIHW", "NCHW"),
        precision=jax.lax.Precision.HIGHEST)


if __name__ == "__main__":
    # Module config: inplane=4, outplane=8, kernel=3x3, stride=1, padding=1,
    # bias=False, bits=[2, 4].  Input: batch=2, channels=4, spatial=16.
    bits = [2, 4]
    inplane, outplane, ksize = 4, 8, 3
    N, H, W = 2, 16, 16

    key = jax.random.PRNGKey(0)
    kx, kw = jax.random.split(key)
    x = jax.random.normal(kx, (N, inplane, H, W), jnp.float32)
    weight = 0.1 * jax.random.normal(kw, (outplane, inplane, ksize, ksize),
                                     jnp.float32)
    alpha_weight = jnp.full((len(bits),), 0.01, jnp.float32)   # .fill_(0.01)

    ref = jax.block_until_ready(
        _reference(x, weight, alpha_weight, bits, (1, 1), (1, 1), (1, 1)))

    # f32 operand path (tight check).
    out_f32 = shared_mix_quant_conv2d(x, weight, alpha_weight, bits,
                                      stride=(1, 1), padding=(1, 1),
                                      dilation=(1, 1),
                                      compute_dtype=jnp.float32)
    out_f32 = jax.block_until_ready(out_f32)
    np.testing.assert_allclose(np.asarray(out_f32), np.asarray(ref),
                               rtol=1e-3, atol=1e-3)

    # default bf16 operand path (native MXU dtype on v5e/v6e/v7x; quantization
    # math stays f32, operands cast only at the matmul boundary).
    out_bf16 = shared_mix_quant_conv2d(x, weight, alpha_weight, bits,
                                       stride=(1, 1), padding=(1, 1),
                                       dilation=(1, 1))
    out_bf16 = jax.block_until_ready(out_bf16)
    np.testing.assert_allclose(np.asarray(out_bf16), np.asarray(ref),
                               rtol=5e-2, atol=5e-2)

    print("KERNEL_OK")
</pallas_src>

<mosaic_0001>
module attributes {stable_mosaic.version = 11 : i64} {
  func.func @_conv_kernel(%arg0: i32, %arg1: memref<8x36xf32, #tpu.memory_space<vmem>>, %arg2: memref<2x4x512xf32, #tpu.memory_space<vmem>>, %arg3: memref<2x8x384xf32, #tpu.memory_space<vmem>>, %arg4: memref<36x768xf32, #tpu.memory_space<vmem>>) attributes {dimension_semantics = [#tpu.dimension_semantics<parallel>], iteration_bounds = array<i64: 1>, scalar_prefetch = 0 : i64, scratch_operands = 1 : i64, tpu.core_type = #tpu.core_type<tc>, window_params = [{pipeline_mode = #tpu.pipeline_mode<synchronous>, transform_indices = @transform_0, window_bounds = array<i64: 8, 36>}, {transform_indices = @transform_1, window_bounds = array<i64: 2, 4, 512>}, {transform_indices = @transform_2, window_bounds = array<i64: 2, 8, 384>}]} {
    %c0 = arith.constant 0 : index
    %c0_0 = arith.constant 0 : index
    %c0_1 = arith.constant 0 : index
    %0 = vector.load %arg2[%c0, %c0_0, %c0_1] : memref<2x4x512xf32, #tpu.memory_space<vmem>>, vector<2x4x512xf32>
    %1 = vector.extract_strided_slice %0 {offsets = [0, 0, 0], sizes = [1, 4, 384], strides = [1, 1, 1]} : vector<2x4x512xf32> to vector<1x4x384xf32>
    %2 = vector.shape_cast %1 : vector<1x4x384xf32> to vector<4x384xf32>
    %c0_2 = arith.constant 0 : index
    %c0_3 = arith.constant 0 : index
    %3 = vector.load %arg4[%c0_2, %c0_3] : memref<36x768xf32, #tpu.memory_space<vmem>>, vector<4x384xf32>
    tpu.vector_store %arg4[%c0_2, %c0_3], %2 {strides = array<i32>} : memref<36x768xf32, #tpu.memory_space<vmem>>, vector<4x384xf32>,
    %4 = vector.extract_strided_slice %0 {offsets = [1, 0, 0], sizes = [1, 4, 384], strides = [1, 1, 1]} : vector<2x4x512xf32> to vector<1x4x384xf32>
    %5 = vector.shape_cast %4 : vector<1x4x384xf32> to vector<4x384xf32>
    %c0_4 = arith.constant 0 : index
    %c384 = arith.constant 384 : index
    %6 = vector.load %arg4[%c0_4, %c384] : memref<36x768xf32, #tpu.memory_space<vmem>>, vector<4x384xf32>
    tpu.vector_store %arg4[%c0_4, %c384], %5 {strides = array<i32>} : memref<36x768xf32, #tpu.memory_space<vmem>>, vector<4x384xf32>,
    %7 = vector.extract_strided_slice %0 {offsets = [0, 0, 1], sizes = [1, 4, 384], strides = [1, 1, 1]} : vector<2x4x512xf32> to vector<1x4x384xf32>
    %8 = vector.shape_cast %7 : vector<1x4x384xf32> to vector<4x384xf32>
    %c4 = arith.constant 4 : index
    %c0_5 = arith.constant 0 : index
    %9 = vector.load %arg4[%c4, %c0_5] : memref<36x768xf32, #tpu.memory_space<vmem>>, vector<4x384xf32>
    tpu.vector_store %arg4[%c4, %c0_5], %8 {strides = array<i32>} : memref<36x768xf32, #tpu.memory_space<vmem>>, vector<4x384xf32>,
    %10 = vector.extract_strided_slice %0 {offsets = [1, 0, 1], sizes = [1, 4, 384], strides = [1, 1, 1]} : vector<2x4x512xf32> to vector<1x4x384xf32>
    %11 = vector.shape_cast %10 : vector<1x4x384xf32> to vector<4x384xf32>
    %c4_6 = arith.constant 4 : index
    %c384_7 = arith.constant 384 : index
    %12 = vector.load %arg4[%c4_6, %c384_7] : memref<36x768xf32, #tpu.memory_space<vmem>>, vector<4x384xf32>
    tpu.vector_store %arg4[%c4_6, %c384_7], %11 {strides = array<i32>} : memref<36x768xf32, #tpu.memory_space<vmem>>, vector<4x384xf32>,
    %13 = vector.extract_strided_slice %0 {offsets = [0, 0, 2], sizes = [1, 4, 384], strides = [1, 1, 1]} : vector<2x4x512xf32> to vector<1x4x384xf32>
    %14 = vector.shape_cast %13 : vector<1x4x384xf32> to vector<4x384xf32>
    %c8 = arith.constant 8 : index
    %c0_8 = arith.constant 0 : index
    %15 = vector.load %arg4[%c8, %c0_8] : memref<36x768xf32, #tpu.memory_space<vmem>>, vector<4x384xf32>
    tpu.vector_store %arg4[%c8, %c0_8], %14 {strides = array<i32>} : memref<36x768xf32, #tpu.memory_space<vmem>>, vector<4x384xf32>,
    %16 = vector.extract_strided_slice %0 {offsets = [1, 0, 2], sizes = [1, 4, 384], strides = [1, 1, 1]} : vector<2x4x512xf32> to vector<1x4x384xf32>
    %17 = vector.shape_cast %16 : vector<1x4x384xf32> to vector<4x384xf32>
    %c8_9 = arith.constant 8 : index
    %c384_10 = arith.constant 384 : index
    %18 = vector.load %arg4[%c8_9, %c384_10] : memref<36x768xf32, #tpu.memory_space<vmem>>, vector<4x384xf32>
    tpu.vector_store %arg4[%c8_9, %c384_10], %17 {strides = array<i32>} : memref<36x768xf32, #tpu.memory_space<vmem>>, vector<4x384xf32>,
    %19 = vector.extract_strided_slice %0 {offsets = [0, 0, 18], sizes = [1, 4, 384], strides = [1, 1, 1]} : vector<2x4x512xf32> to vector<1x4x384xf32>
    %20 = vector.shape_cast %19 : vector<1x4x384xf32> to vector<4x384xf32>
    %c12 = arith.constant 12 : index
    %c0_11 = arith.constant 0 : index
    %21 = vector.load %arg4[%c12, %c0_11] : memref<36x768xf32, #tpu.memory_space<vmem>>, vector<4x384xf32>
    tpu.vector_store %arg4[%c12, %c0_11], %20 {strides = array<i32>} : memref<36x768xf32, #tpu.memory_space<vmem>>, vector<4x384xf32>,
    %22 = vector.extract_strided_slice %0 {offsets = [1, 0, 18], sizes = [1, 4, 384], strides = [1, 1, 1]} : vector<2x4x512xf32> to vector<1x4x384xf32>
    %23 = vector.shape_cast %22 : vector<1x4x384xf32> to vector<4x384xf32>
    %c12_12 = arith.constant 12 : index
    %c384_13 = arith.constant 384 : index
    %24 = vector.load %arg4[%c12_12, %c384_13] : memref<36x768xf32, #tpu.memory_space<vmem>>, vector<4x384xf32>
    tpu.vector_store %arg4[%c12_12, %c384_13], %23 {strides = array<i32>} : memref<36x768xf32, #tpu.memory_space<vmem>>, vector<4x384xf32>,
    %25 = vector.extract_strided_slice %0 {offsets = [0, 0, 19], sizes = [1, 4, 384], strides = [1, 1, 1]} : vector<2x4x512xf32> to vector<1x4x384xf32>
    %26 = vector.shape_cast %25 : vector<1x4x384xf32> to vector<4x384xf32>
    %c16 = arith.constant 16 : index
    %c0_14 = arith.constant 0 : index
    %27 = vector.load %arg4[%c16, %c0_14] : memref<36x768xf32, #tpu.memory_space<vmem>>, vector<4x384xf32>
    tpu.vector_store %arg4[%c16, %c0_14], %26 {strides = array<i32>} : memref<36x768xf32, #tpu.memory_space<vmem>>, vector<4x384xf32>,
    %28 = vector.extract_strided_slice %0 {offsets = [1, 0, 19], sizes = [1, 4, 384], strides = [1, 1, 1]} : vector<2x4x512xf32> to vector<1x4x384xf32>
    %29 = vector.shape_cast %28 : vector<1x4x384xf32> to vector<4x384xf32>
    %c16_15 = arith.constant 16 : index
    %c384_16 = arith.constant 384 : index
    %30 = vector.load %arg4[%c16_15, %c384_16] : memref<36x768xf32, #tpu.memory_space<vmem>>, vector<4x384xf32>
    tpu.vector_store %arg4[%c16_15, %c384_16], %29 {strides = array<i32>} : memref<36x768xf32, #tpu.memory_space<vmem>>, vector<4x384xf32>,
    %31 = vector.extract_strided_slice %0 {offsets = [0, 0, 20], sizes = [1, 4, 384], strides = [1, 1, 1]} : vector<2x4x512xf32> to vector<1x4x384xf32>
    %32 = vector.shape_cast %31 : vector<1x4x384xf32> to vector<4x384xf32>
    %c20 = arith.constant 20 : index
    %c0_17 = arith.constant 0 : index
    %33 = vector.load %arg4[%c20, %c0_17] : memref<36x768xf32, #tpu.memory_space<vmem>>, vector<4x384xf32>
    tpu.vector_store %arg4[%c20, %c0_17], %32 {strides = array<i32>} : memref<36x768xf32, #tpu.memory_space<vmem>>, vector<4x384xf32>,
    %34 = vector.extract_strided_slice %0 {offsets = [1, 0, 20], sizes = [1, 4, 384], strides = [1, 1, 1]} : vector<2x4x512xf32> to vector<1x4x384xf32>
    %35 = vector.shape_cast %34 : vector<1x4x384xf32> to vector<4x384xf32>
    %c20_18 = arith.constant 20 : index
    %c384_19 = arith.constant 384 : index
    %36 = vector.load %arg4[%c20_18, %c384_19] : memref<36x768xf32, #tpu.memory_space<vmem>>, vector<4x384xf32>
    tpu.vector_store %arg4[%c20_18, %c384_19], %35 {strides = array<i32>} : memref<36x768xf32, #tpu.memory_space<vmem>>, vector<4x384xf32>,
    %37 = vector.extract_strided_slice %0 {offsets = [0, 0, 36], sizes = [1, 4, 384], strides = [1, 1, 1]} : vector<2x4x512xf32> to vector<1x4x384xf32>
    %38 = vector.shape_cast %37 : vector<1x4x384xf32> to vector<4x384xf32>
    %c24 = arith.constant 24 : index
    %c0_20 = arith.constant 0 : index
    %39 = vector.load %arg4[%c24, %c0_20] : memref<36x768xf32, #tpu.memory_space<vmem>>, vector<4x384xf32>
    tpu.vector_store %arg4[%c24, %c0_20], %38 {strides = array<i32>} : memref<36x768xf32, #tpu.memory_space<vmem>>, vector<4x384xf32>,
    %40 = vector.extract_strided_slice %0 {offsets = [1, 0, 36], sizes = [1, 4, 384], strides = [1, 1, 1]} : vector<2x4x512xf32> to vector<1x4x384xf32>
    %41 = vector.shape_cast %40 : vector<1x4x384xf32> to vector<4x384xf32>
    %c24_21 = arith.constant 24 : index
    %c384_22 = arith.constant 384 : index
    %42 = vector.load %arg4[%c24_21, %c384_22] : memref<36x768xf32, #tpu.memory_space<vmem>>, vector<4x384xf32>
    tpu.vector_store %arg4[%c24_21, %c384_22], %41 {strides = array<i32>} : memref<36x768xf32, #tpu.memory_space<vmem>>, vector<4x384xf32>,
    %43 = vector.extract_strided_slice %0 {offsets = [0, 0, 37], sizes = [1, 4, 384], strides = [1, 1, 1]} : vector<2x4x512xf32> to vector<1x4x384xf32>
    %44 = vector.shape_cast %43 : vector<1x4x384xf32> to vector<4x384xf32>
    %c28 = arith.constant 28 : index
    %c0_23 = arith.constant 0 : index
    %45 = vector.load %arg4[%c28, %c0_23] : memref<36x768xf32, #tpu.memory_space<vmem>>, vector<4x384xf32>
    tpu.vector_store %arg4[%c28, %c0_23], %44 {strides = array<i32>} : memref<36x768xf32, #tpu.memory_space<vmem>>, vector<4x384xf32>,
    %46 = vector.extract_strided_slice %0 {offsets = [1, 0, 37], sizes = [1, 4, 384], strides = [1, 1, 1]} : vector<2x4x512xf32> to vector<1x4x384xf32>
    %47 = vector.shape_cast %46 : vector<1x4x384xf32> to vector<4x384xf32>
    %c28_24 = arith.constant 28 : index
    %c384_25 = arith.constant 384 : index
    %48 = vector.load %arg4[%c28_24, %c384_25] : memref<36x768xf32, #tpu.memory_space<vmem>>, vector<4x384xf32>
    tpu.vector_store %arg4[%c28_24, %c384_25], %47 {strides = array<i32>} : memref<36x768xf32, #tpu.memory_space<vmem>>, vector<4x384xf32>,
    %49 = vector.extract_strided_slice %0 {offsets = [0, 0, 38], sizes = [1, 4, 384], strides = [1, 1, 1]} : vector<2x4x512xf32> to vector<1x4x384xf32>
    %50 = vector.shape_cast %49 : vector<1x4x384xf32> to vector<4x384xf32>
    %c32 = arith.constant 32 : index
    %c0_26 = arith.constant 0 : index
    %51 = vector.load %arg4[%c32, %c0_26] : memref<36x768xf32, #tpu.memory_space<vmem>>, vector<4x384xf32>
    tpu.vector_store %arg4[%c32, %c0_26], %50 {strides = array<i32>} : memref<36x768xf32, #tpu.memory_space<vmem>>, vector<4x384xf32>,
    %52 = vector.extract_strided_slice %0 {offsets = [1, 0, 38], sizes = [1, 4, 384], strides = [1, 1, 1]} : vector<2x4x512xf32> to vector<1x4x384xf32>
    %53 = vector.shape_cast %52 : vector<1x4x384xf32> to vector<4x384xf32>
    %c32_27 = arith.constant 32 : index
    %c384_28 = arith.constant 384 : index
    %54 = vector.load %arg4[%c32_27, %c384_28] : memref<36x768xf32, #tpu.memory_space<vmem>>, vector<4x384xf32>
    tpu.vector_store %arg4[%c32_27, %c384_28], %53 {strides = array<i32>} : memref<36x768xf32, #tpu.memory_space<vmem>>, vector<4x384xf32>,
    %c0_29 = arith.constant 0 : index
    %c0_30 = arith.constant 0 : index
    %55 = vector.load %arg1[%c0_29, %c0_30] : memref<8x36xf32, #tpu.memory_space<vmem>>, vector<8x36xf32>
    %c0_31 = arith.constant 0 : index
    %c0_32 = arith.constant 0 : index
    %56 = vector.load %arg4[%c0_31, %c0_32] : memref<36x768xf32, #tpu.memory_space<vmem>>, vector<36x768xf32>
    %cst = arith.constant dense<0.000000e+00> : vector<8x768xf32>
    %57 = tpu.matmul %55, %56, %cst {dimension_numbers = #tpu.dot_dimension_numbers<[1], [0], [0], [1], [0, 0, 1, 1], [], []>} : vector<8x36xf32>, vector<36x768xf32>, vector<8x768xf32> -> vector<8x768xf32>
    %58 = vector.extract_strided_slice %57 {offsets = [0, 0], sizes = [8, 384], strides = [1, 1]} : vector<8x768xf32> to vector<8x384xf32>
    %c0_33 = arith.constant 0 : index
    %c0_34 = arith.constant 0 : index
    %c0_35 = arith.constant 0 : index
    %59 = vector.load %arg3[%c0_33, %c0_34, %c0_35] : memref<2x8x384xf32, #tpu.memory_space<vmem>>, vector<1x8x384xf32>
    %60 = vector.shape_cast %59 : vector<1x8x384xf32> to vector<8x384xf32>
    %61 = vector.shape_cast %58 : vector<8x384xf32> to vector<1x8x384xf32>
    tpu.vector_store %arg3[%c0_33, %c0_34, %c0_35], %61 {strides = array<i32>} : memref<2x8x384xf32, #tpu.memory_space<vmem>>, vector<1x8x384xf32>,
    %62 = vector.extract_strided_slice %57 {offsets = [0, 384], sizes = [8, 384], strides = [1, 1]} : vector<8x768xf32> to vector<8x384xf32>
    %c1 = arith.constant 1 : index
    %c0_36 = arith.constant 0 : index
    %c0_37 = arith.constant 0 : index
    %63 = vector.load %arg3[%c1, %c0_36, %c0_37] : memref<2x8x384xf32, #tpu.memory_space<vmem>>, vector<1x8x384xf32>
    %64 = vector.shape_cast %63 : vector<1x8x384xf32> to vector<8x384xf32>
    %65 = vector.shape_cast %62 : vector<8x384xf32> to vector<1x8x384xf32>
    tpu.vector_store %arg3[%c1, %c0_36, %c0_37], %65 {strides = array<i32>} : memref<2x8x384xf32, #tpu.memory_space<vmem>>, vector<1x8x384xf32>,
    return
  }
  func.func @transform_0(%arg0: i32) -> (i32, i32) {
    %c0_i32 = arith.constant 0 : i32
    %c0_i32_0 = arith.constant 0 : i32
    %c0_i32_1 = arith.constant 0 : i32
    return %c0_i32, %c0_i32_0 : i32, i32
  }
  func.func @transform_1(%arg0: i32) -> (i32, i32, i32) {
    %c0_i32 = arith.constant 0 : i32
    %c0_i32_0 = arith.constant 0 : i32
    %c0_i32_1 = arith.constant 0 : i32
    return %arg0, %c0_i32, %c0_i32_0 : i32, i32, i32
  }
  func.func @transform_2(%arg0: i32) -> (i32, i32, i32) {
    %c0_i32 = arith.constant 0 : i32
    %c0_i32_0 = arith.constant 0 : i32
    %c0_i32_1 = arith.constant 0 : i32
    return %arg0, %c0_i32, %c0_i32_0 : i32, i32, i32
  }
}

</mosaic_0001>

<bundles_post_ra>
// kernel: tpu_custom_call.1
= control target key start
LH: loop header
LB: loop body
LE: loop exit
PB: predicated region body
PF: predicated region fallthrough
CT: control target
= control target key end

     0   :  { %7 = vsyncpa [#allocation4], 0  ;;  %s986_s0 = inlined_call_operand.hbm [shape: f32[8,36], index: 0, kind: input, shape index: {}]   ;;  %s987_s1 = inlined_call_operand.hbm [shape: f32[2,4,512], index: 1, kind: input, shape index: {}]   ;;  %s988_s2 = inlined_call_operand.hbm [shape: f32[2,8,384], index: 2, kind: output, shape index: {}]  }
   0x1   :  { %8 = vsyncpa [#allocation7], 0 }
   0x2   :  { %9 = vsyncpa [#allocation5], 0  ;;  %s733_s9 = smov [#allocation3]   ;;  %s734_s11 = smov [#allocation6]  }
   0x3   :  { %s16_s10 = sshll.u32 %s733_s9, 4  ;;  %s25_s12 = sshll.u32 %s734_s11, 4  ;;  %s17_s10 = int_to_ptr.vmem [resolvable:$true] %s16_s10  ;;  %s26_s12 = int_to_ptr.vmem [resolvable:$true] %s25_s12 }
   0x4   :  { %s675_s13 = scalar_lea.vmem %s17_s10, 128  ;;  %p680_p1 = scmp.lt.s32.totalorder %s17_s10, %s17_s10 }
   0x5   :  { %p676_p0 = scmp.ne.s32.totalorder %s17_s10, %s675_s13  ;;  %p681_p2 = scmp.lt.s32.totalorder %s675_s13, %s675_s13 }
   0x7   :  { %p682_p3 = por %p681_p2, %p680_p1 }
   0x9   :  { %p683_p4 = pnand %p682_p3, %p676_p0 }
   0xb   :  { %686 = shalt.err (!%p683_p4)
}
   0xc   :  { %19 = dma.hbm_to_vmem [thread:$0]  %s986_s0, 128, %s17_s10, [#allocation4]  }
   0xd   :  { %s695_s16 = scalar_lea.vmem %s26_s12, 512  ;;  %p700_p6 = scmp.lt.s32.totalorder %s26_s12, %s26_s12 }
   0xe   :  { %p696_p5 = scmp.ne.s32.totalorder %s26_s12, %s695_s16  ;;  %p701_p7 = scmp.lt.s32.totalorder %s695_s16, %s695_s16 }
  0x10   :  { %p702_p8 = por %p701_p7, %p700_p6 }
  0x12   :  { %p703_p9 = pnand %p702_p8, %p696_p5 }
  0x14   :  { %706 = shalt.err (!%p703_p9)
}
  0x15   :  { %s735_s17 = smov 256   ;;  %s736_s18 = smov 16  }
  0x16   :  { %31 = dma.hbm_to_vmem [thread:$0]  %s987_s1, 512, %s26_s12, [#allocation7], %s735_s17, %s735_s17, %s736_s18  }
  0x17   :  { %727 = dma.done.wait [#allocation4], 128  }
  0x18   :  { %728 = vsyncadd [#allocation4], 4294967168 }
  0x19   :  { %729 = dma.done.wait [#allocation7], 512  }
  0x1a   :  { %730 = vsyncadd [#allocation7], 4294966784  ;;  %v770_v0 = vld [vmem:[#allocation6 + $0x8] sm:$0xff]  ;;  %v38_v1 = vld [vmem:[#allocation6] sm:$0xff]  ;;  %s737_s0 = smov 90   ;;  %s738_s1 = smov 92  }
  0x1b   :  { %v772_v2 = vld [vmem:[#allocation6 + $0x10] sm:$0xff]  ;;  %311 = vrot.lane.b32.xlu0 %v770_v0, %s737_s0  ;;  %48 = vst [vmem:[#allocation2 + $0xd8] sm:$0xf] %v770_v0  ;;  %307 = vrot.lane.b32.xlu1 %v38_v1, %s737_s0  ;;  %46 = vst [vmem:[#allocation2 + $0xb0] sm:$0xf] %v38_v1  ;;  %v44_v3 = vcombine.high %v38_v1, %v38_v1  ;;  %v779_v4 = vld [vmem:[#allocation6 + $0x18] sm:$0xff]  ;;  %v57_v6 = vcombine.low %v770_v0, %v770_v0 }
  0x1c   :  { %53 = vst [vmem:[#allocation2 + $0x18] sm:$0xf] %v772_v2  ;;  %v783_v5 = vcombine.high %v772_v2, %v772_v2  ;;  %55 = vst [vmem:[#allocation2 + $0x68] sm:$0xf] %v779_v4  ;;  %s739_s21 = smov 91   ;;  %v56_v7 = vcombine.low %v38_v1, %v38_v1  ;;  %s740_s22 = smov 109   ;;  %v114_v8 = vcombine.high %v779_v4, %v779_v4 }
  0x1d   :  { %47 = vst [vmem:[#allocation2] sm:$0xf] %v44_v3  ;;  %s741_s23 = smov 108   ;;  %s742_s24 = smov 126   ;;  %v745_v9 = vmov 0.0   ;;  %v95_v10 = vcombine.high %v770_v0, %v770_v0  ;;  %v76_v11 = vcombine.low %v772_v2, %v772_v2  ;;  %v77_v12 = vcombine.low %v779_v4, %v779_v4 }
  0x1e   :  { %54 = vst [vmem:[#allocation2 + $0x50] sm:$0xf] %v783_v5  ;;  %s743_s25 = smov 110   ;;  %s744_s26 = smov 127   ;;  %460 = vmatprep.mubr.f32.mxu0 %v745_v9  ;;  %531 = vmatprep.mubr.f32.mxu1 %v745_v9  ;;  %vm245_vm0 = vcmask 752640   ;;  %vm315_vm1 = vcmask 736256  }
  0x1f   :  { %241 = vrot.lane.b32.xlu0 %v770_v0, %s738_s1  ;;  %274 = vrot.lane.b32.xlu1 %v38_v1, %s739_s21  ;;  %vm280_vm2 = vcmask 744448   ;;  %vm377_vm3 = vcmask 1043456   ;;  %vm175_vm4 = vcmask 891904   ;;  %vm210_vm5 = vcmask 883712   ;;  %s746_s27 = smov [#allocation8]  }
  0x20   :  { %vm104_vm6 = vcmask 1031168   ;;  %vm140_vm7 = vcmask 900096   ;;  %vm66_vm8 = vcmask 1039360   ;;  %vm373_vm9 = vcmask 293888   ;;  %s621_s28 = sshll.u32 %s746_s27, 4  ;;  %s622_s28 = int_to_ptr.vmem [resolvable:$true] %s621_s28 }
  0x21   :  { %s707_s29 = scalar_lea.vmem %s622_s28, 768  ;;  %p712_p11 = scmp.lt.s32.totalorder %s622_s28, %s622_s28 }
  0x22   :  { %p708_p10 = scmp.ne.s32.totalorder %s622_s28, %s707_s29  ;;  %p713_p12 = scmp.lt.s32.totalorder %s707_s29, %s707_s29 }
  0x23   :  { %239 = vrot.lane.b32.xlu1 %v44_v3, %s738_s1  ;;  %309 = vrot.lane.b32.xlu0 %v44_v3, %s737_s0 }
  0x24   :  { %p714_p13 = por %p713_p12, %p712_p11 }
  0x26   :  { %p715_p0 = pnand %p714_p13, %p708_p10 }
  0x27   :  { %237 = vrot.lane.b32.xlu1 %v38_v1, %s738_s1  ;;  %276 = vrot.lane.b32.xlu0 %v57_v6, %s739_s21 }
  0x2b   :  { %169 = vrot.lane.b32.xlu1 %v44_v3, %s740_s22  ;;  %272 = vrot.lane.b32.xlu0 %v56_v7, %s739_s21 }
  0x2f   :  { %204 = vrot.lane.b32.xlu1 %v38_v1, %s741_s23  ;;  %171 = vrot.lane.b32.xlu0 %v770_v0, %s740_s22 }
  0x33   :  { %167 = vrot.lane.b32.xlu1 %v38_v1, %s740_s22  ;;  %206 = vrot.lane.b32.xlu0 %v57_v6, %s741_s23 }
  0x37   :  { %98 = vrot.lane.b32.xlu1 %v44_v3, %s742_s24  ;;  %202 = vrot.lane.b32.xlu0 %v56_v7, %s741_s23 }
  0x3b   :  { %134 = vrot.lane.b32.xlu1 %v38_v1, %s743_s25  ;;  %100 = vrot.lane.b32.xlu0 %v770_v0, %s742_s24 }
  0x3f   :  { %96 = vrot.lane.b32.xlu1 %v38_v1, %s742_s24  ;;  %136 = vrot.lane.b32.xlu0 %v57_v6, %s743_s25 }
  0x43   :  { %60 = vrot.lane.b32.xlu1 %v38_v1, %s744_s26  ;;  %132 = vrot.lane.b32.xlu0 %v56_v7, %s743_s25 }
  0x47   :  { %58 = vrot.lane.b32.xlu1 %v56_v7, %s744_s26  ;;  %62 = vrot.lane.b32.xlu0 %v57_v6, %s744_s26  ;;  %v933_v6 = vld [vmem:[#allocation3] sm:$0xff] }
  0x4b   :  { %327 = vrot.lane.b32.xlu1 %v783_v5, %s737_s0  ;;  %325 = vrot.lane.b32.xlu0 %v772_v2, %s737_s0 }
  0x4f   :  { %331 = vrot.lane.b32.xlu1 %v114_v8, %s737_s0  ;;  %329 = vrot.lane.b32.xlu0 %v779_v4, %s737_s0 }
  0x53   :  { %255 = vrot.lane.b32.xlu1 %v772_v2, %s738_s1  ;;  %313 = vrot.lane.b32.xlu0 %v95_v10, %s737_s0 }
  0x57   :  { %259 = vrot.lane.b32.xlu1 %v779_v4, %s738_s1  ;;  %257 = vrot.lane.b32.xlu0 %v783_v5, %s738_s1 }
  0x5b   :  { %290 = vrot.lane.b32.xlu1 %v76_v11, %s739_s21  ;;  %261 = vrot.lane.b32.xlu0 %v114_v8, %s738_s1 }
  0x5f   :  { %294 = vrot.lane.b32.xlu1 %v77_v12, %s739_s21  ;;  %292 = vrot.lane.b32.xlu0 %v772_v2, %s739_s21 }
  0x63   :  { %243 = vrot.lane.b32.xlu1 %v95_v10, %s738_s1  ;;  %296 = vrot.lane.b32.xlu0 %v779_v4, %s739_s21 }
  0x67   :  { %185 = vrot.lane.b32.xlu1 %v772_v2, %s740_s22  ;;  %278 = vrot.lane.b32.xlu0 %v770_v0, %s739_s21 }
  0x6b   :  { %189 = vrot.lane.b32.xlu1 %v779_v4, %s740_s22  ;;  %187 = vrot.lane.b32.xlu0 %v783_v5, %s740_s22 }
  0x6f   :  { %220 = vrot.lane.b32.xlu1 %v76_v11, %s741_s23  ;;  %191 = vrot.lane.b32.xlu0 %v114_v8, %s740_s22 }
  0x73   :  { %224 = vrot.lane.b32.xlu1 %v77_v12, %s741_s23  ;;  %222 = vrot.lane.b32.xlu0 %v772_v2, %s741_s23 }
  0x77   :  { %173 = vrot.lane.b32.xlu1 %v95_v10, %s740_s22  ;;  %226 = vrot.lane.b32.xlu0 %v779_v4, %s741_s23 }
  0x7b   :  { %115 = vrot.lane.b32.xlu1 %v772_v2, %s742_s24  ;;  %208 = vrot.lane.b32.xlu0 %v770_v0, %s741_s23 }
  0x7f   :  { %119 = vrot.lane.b32.xlu1 %v779_v4, %s742_s24  ;;  %117 = vrot.lane.b32.xlu0 %v783_v5, %s742_s24 }
  0x83   :  { %150 = vrot.lane.b32.xlu1 %v76_v11, %s743_s25  ;;  %121 = vrot.lane.b32.xlu0 %v114_v8, %s742_s24 }
  0x87   :  { %154 = vrot.lane.b32.xlu1 %v77_v12, %s743_s25  ;;  %152 = vrot.lane.b32.xlu0 %v772_v2, %s743_s25 }
  0x8b   :  { %102 = vrot.lane.b32.xlu1 %v95_v10, %s742_s24  ;;  %156 = vrot.lane.b32.xlu0 %v779_v4, %s743_s25 }
  0x8d   :  { %v878_v13 = vpop.permute.xlu0 %311  ;;  %v308_v14 = vpop.permute.xlu1 %307 }
  0x8f   :  { %78 = vrot.lane.b32.xlu1 %v76_v11, %s744_s26  ;;  %138 = vrot.lane.b32.xlu0 %v770_v0, %s743_s25 }
  0x91   :  { %v883_v15 = vpop.permute.xlu0 %241  ;;  %v275_v16 = vpop.permute.xlu1 %274 }
  0x93   :  { %82 = vrot.lane.b32.xlu1 %v77_v12, %s744_s26  ;;  %80 = vrot.lane.b32.xlu0 %v772_v2, %s744_s26 }
  0x95   :  { %v240_v17 = vpop.permute.xlu1 %239  ;;  %v310_v18 = vpop.permute.xlu0 %309 }
  0x96   :  { %v247_v19 = vsel %vm245_vm0, %v240_v17, %v883_v15  ;;  %v316_v20 = vsel %vm315_vm1, %v308_v14, %v310_v18  ;;  %v317_v21 = vsel %vm315_vm1, %v310_v18, %v878_v13 }
  0x97   :  { %253 = vst [vmem:[#allocation2 + $0x10] sm:$0xf] %v247_v19  ;;  %322 = vst [vmem:[#allocation2 + $0x58] sm:$0xf] %v316_v20  ;;  %64 = vrot.lane.b32.xlu1 %v770_v0, %s744_s26  ;;  %84 = vrot.lane.b32.xlu0 %v779_v4, %s744_s26 }
  0x98   :  { %323 = vst [vmem:[#allocation2 + $0xd0] sm:$0xf] %v317_v21 }
  0x99   :  { %v238_v22 = vpop.permute.xlu1 %237  ;;  %v897_v23 = vpop.permute.xlu0 %276 }
  0x9a   :  { %v246_v24 = vsel %vm245_vm0, %v238_v22, %v240_v17  ;;  %v282_v25 = vsel %vm280_vm2, %v275_v16, %v897_v23 }
  0x9b   :  { %252 = vst [vmem:[#allocation2 + $0xc0] sm:$0xf] %v246_v24  ;;  %288 = vst [vmem:[#allocation2 + $0x10] sm:$0xf0] %v282_v25 }
  0x9d   :  { %v170_v26 = vpop.permute.xlu1 %169  ;;  %v273_v27 = vpop.permute.xlu0 %272 }
  0x9e   :  { %v281_v28 = vsel %vm280_vm2, %v273_v27, %v275_v16  ;;  %v367_v30 = vld [vmem:[#allocation2 + $0x58] sm:$0xf] }
  0x9f   :  { %v368_v29 = vld [vmem:[#allocation2 + $0xd0] sm:$0xf]  ;;  %287 = vst [vmem:[#allocation2 + $0xc0] sm:$0xf0] %v281_v28 }
  0xa0   :  { %634 = vmatprep.subr.msk.mxu0 %vm377_vm3, %v368_v29 }
  0xa1   :  { %635 = vmatpush1.msk.msra.mxu0 %vm377_vm3, %v367_v30  ;;  %v205_v31 = vpop.permute.xlu1 %204  ;;  %v905_v32 = vpop.permute.xlu0 %171 }
  0xa2   :  { %v177_v33 = vsel %vm175_vm4, %v170_v26, %v905_v32  ;;  %v362_v34 = vld [vmem:[#allocation2 + $0x10] sm:$0xff] }
  0xa3   :  { %183 = vst [vmem:[#allocation2 + $0xa8] sm:$0xf] %v177_v33  ;;  %420 = vmatprep.subr.mxu0 %v362_v34 }
  0xa5   :  { %v168_v35 = vpop.permute.xlu1 %167  ;;  %v909_v36 = vpop.permute.xlu0 %206 }
  0xa6   :  { %v176_v37 = vsel %vm175_vm4, %v168_v35, %v170_v26  ;;  %v212_v38 = vsel %vm210_vm5, %v205_v31, %v909_v36  ;;  %v361_v39 = vld [vmem:[#allocation2 + $0xc0] sm:$0xff] }
  0xa7   :  { %182 = vst [vmem:[#allocation2 + $0x60] sm:$0xf] %v176_v37  ;;  %218 = vst [vmem:[#allocation2 + $0xa8] sm:$0xf0] %v212_v38  ;;  %421 = vmatpush1.msra.mxu0 %v361_v39 }
  0xa9   :  { %v99_v40 = vpop.permute.xlu1 %98  ;;  %v203_v41 = vpop.permute.xlu0 %202 }
  0xaa   :  { %v211_v42 = vsel %vm210_vm5, %v203_v41, %v205_v31 }
  0xab   :  { %217 = vst [vmem:[#allocation2 + $0x60] sm:$0xf0] %v211_v42 }
  0xad   :  { %v135_v43 = vpop.permute.xlu1 %134  ;;  %v915_v44 = vpop.permute.xlu0 %100 }
  0xae   :  { %v106_v45 = vsel %vm104_vm6, %v99_v40, %v915_v44  ;;  %v356_v46 = vld [vmem:[#allocation2 + $0xa8] sm:$0xff] }
  0xaf   :  { %112 = vst [vmem:[#allocation2 + $0x48] sm:$0xf] %v106_v45  ;;  %422 = vmatprep.subr.mxu0 %v356_v46 }
  0xb1   :  { %v97_v47 = vpop.permute.xlu1 %96  ;;  %v919_v48 = vpop.permute.xlu0 %136 }
  0xb2   :  { %v105_v49 = vsel %vm104_vm6, %v97_v47, %v99_v40  ;;  %v142_v50 = vsel %vm140_vm7, %v135_v43, %v919_v48  ;;  %v355_v51 = vld [vmem:[#allocation2 + $0x60] sm:$0xff] }
  0xb3   :  { %111 = vst [vmem:[#allocation2 + $0x30] sm:$0xf] %v105_v49  ;;  %148 = vst [vmem:[#allocation2 + $0x48] sm:$0xf0] %v142_v50  ;;  %423 = vmatpush1.msra.mxu0 %v355_v51 }
  0xb5   :  { %v61_v52 = vpop.permute.xlu1 %60  ;;  %v133_v53 = vpop.permute.xlu0 %132 }
  0xb6   :  { %v141_v54 = vsel %vm140_vm7, %v133_v53, %v135_v43 }
  0xb7   :  { %147 = vst [vmem:[#allocation2 + $0x30] sm:$0xf0] %v141_v54 }
  0xb9   :  { %v59_v55 = vpop.permute.xlu1 %58  ;;  %v925_v56 = vpop.permute.xlu0 %62 }
  0xba   :  { %v67_v57 = vsel %vm66_vm8, %v59_v55, %v61_v52  ;;  %v68_v58 = vsel %vm66_vm8, %v61_v52, %v925_v56  ;;  %v350_v59 = vld [vmem:[#allocation2 + $0x48] sm:$0xff] }
  0xbb   :  { %73 = vst [vmem:[#allocation2 + $0xb0] sm:$0xf0] %v67_v57  ;;  %74 = vst [vmem:[#allocation2] sm:$0xf0] %v68_v58  ;;  %424 = vmatprep.subr.mxu0 %v350_v59 }
  0xbd   :  { %v328_v60 = vpop.permute.xlu1 %327  ;;  %v326_v61 = vpop.permute.xlu0 %325 }
  0xbe   :  { %v333_v62 = vsel %vm315_vm1, %v326_v61, %v328_v60  ;;  %v349_v63 = vld [vmem:[#allocation2 + $0x30] sm:$0xff] }
  0xbf   :  { %339 = vst [vmem:[#allocation2 + $0xc8] sm:$0xf] %v333_v62  ;;  %425 = vmatpush1.msra.mxu0 %v349_v63 }
  0xc1   :  { %v332_v0 = vpop.permute.xlu1 %331  ;;  %v330_v1 = vpop.permute.xlu0 %329 }
  0xc2   :  { %v334_v2 = vsel %vm315_vm1, %v328_v60, %v330_v1  ;;  %v335_v3 = vsel %vm315_vm1, %v330_v1, %v332_v0  ;;  %v344_v4 = vld [vmem:[#allocation2] sm:$0xff]  ;;  %v343_v5 = vld [vmem:[#allocation2 + $0xb0] sm:$0xff] }
  0xc3   :  { %340 = vst [vmem:[#allocation2 + $0xe0] sm:$0xf] %v334_v2  ;;  %341 = vst [vmem:[#allocation2 + $0x20] sm:$0xf] %v335_v3  ;;  %426 = vmatprep.subr.mxu0 %v344_v4 }
  0xc4   :  { %427 = vmatpush1.msra.mxu0 %v343_v5 }
  0xc5   :  { %v256_v7 = vpop.permute.xlu1 %255  ;;  %v314_v8 = vpop.permute.xlu0 %313  ;;  %636 = vmatmul.mubr.msk.f32.vlgmr.msra.gmra.mxu0 %vm373_vm9, %v933_v6 }
  0xc6   :  { %v318_v10 = vsel %vm315_vm1, %v878_v13, %v314_v8  ;;  %v370_v11 = vld [vmem:[#allocation2 + $0xc8] sm:$0xf]  ;;  %602 = vmatprep.mubr.f32.mxu0 %v745_v9 }
  0xc7   :  { %324 = vst [vmem:[#allocation2 + $0x98] sm:$0xf] %v318_v10  ;;  %637 = vmatprep.subr.msk.mxu1 %vm377_vm3, %v370_v11 }
  0xc9   :  { %v260_v12 = vpop.permute.xlu1 %259  ;;  %v258_v14 = vpop.permute.xlu0 %257 }
  0xca   :  { %v263_v16 = vsel %vm245_vm0, %v256_v7, %v258_v14  ;;  %v264_v17 = vsel %vm245_vm0, %v258_v14, %v260_v12  ;;  %v372_v18 = vld [vmem:[#allocation2 + $0x20] sm:$0xf] }
  0xcb   :  { %v371_v19 = vld [vmem:[#allocation2 + $0xe0] sm:$0xf]  ;;  %269 = vst [vmem:[#allocation2 + $0x28] sm:$0xf] %v263_v16  ;;  %270 = vst [vmem:[#allocation2 + $0x90] sm:$0xf] %v264_v17  ;;  %640 = vmatprep.subr.msk.mxu0 %vm377_vm3, %v372_v18 }
  0xcc   :  { %641 = vmatpush1.msk.msra.mxu0 %vm377_vm3, %v371_v19 }
  0xcd   :  { %v291_v13 = vpop.permute.xlu1 %290  ;;  %v262_v20 = vpop.permute.xlu0 %261 }
  0xce   :  { %v265_v9 = vsel %vm245_vm0, %v260_v12, %v262_v20  ;;  %v369_v21 = vld [vmem:[#allocation2 + $0x98] sm:$0xf] }
  0xcf   :  { %271 = vst [vmem:[#allocation2 + $0xa0] sm:$0xf] %v265_v9  ;;  %638 = vmatpush1.msk.msra.mxu1 %vm377_vm3, %v369_v21 }
  0xd1   :  { %v295_v22 = vpop.permute.xlu1 %294  ;;  %v293_v24 = vpop.permute.xlu0 %292 }
  0xd2   :  { %v298_v25 = vsel %vm280_vm2, %v291_v13, %v293_v24  ;;  %v299_v26 = vsel %vm280_vm2, %v293_v24, %v295_v22 }
  0xd3   :  { %304 = vst [vmem:[#allocation2 + $0x28] sm:$0xf0] %v298_v25  ;;  %305 = vst [vmem:[#allocation2 + $0x90] sm:$0xf0] %v299_v26 }
  0xd5   :  { %v244_v27 = vpop.permute.xlu1 %243  ;;  %v297_v28 = vpop.permute.xlu0 %296 }
  0xd6   :  { %v248_v29 = vsel %vm245_vm0, %v883_v15, %v244_v27  ;;  %v300_v30 = vsel %vm280_vm2, %v295_v22, %v297_v28 }
  0xd7   :  { %254 = vst [vmem:[#allocation2 + $0x38] sm:$0xf] %v248_v29  ;;  %306 = vst [vmem:[#allocation2 + $0xa0] sm:$0xf0] %v300_v30 }
  0xd9   :  { %v186_v31 = vpop.permute.xlu1 %185  ;;  %v279_v33 = vpop.permute.xlu0 %278 }
  0xda   :  { %v283_v34 = vsel %vm280_vm2, %v897_v23, %v279_v33  ;;  %v364_v35 = vld [vmem:[#allocation2 + $0x28] sm:$0xff]  ;;  %v365_v15 = vld [vmem:[#allocation2 + $0x90] sm:$0xff] }
  0xdb   :  { %289 = vst [vmem:[#allocation2 + $0x38] sm:$0xf0] %v283_v34  ;;  %491 = vmatprep.subr.mxu1 %v364_v35 }
  0xdd   :  { %v190_v37 = vpop.permute.xlu1 %189  ;;  %v188_v38 = vpop.permute.xlu0 %187 }
  0xde   :  { %v193_v39 = vsel %vm175_vm4, %v186_v31, %v188_v38  ;;  %v194_v40 = vsel %vm175_vm4, %v188_v38, %v190_v37  ;;  %v366_v41 = vld [vmem:[#allocation2 + $0xa0] sm:$0xff] }
  0xdf   :  { %199 = vst [vmem:[#allocation2 + $0x40] sm:$0xf] %v193_v39  ;;  %200 = vst [vmem:[#allocation2 + $0x8] sm:$0xf] %v194_v40  ;;  %562 = vmatprep.subr.mxu0 %v366_v41 }
  0xe0   :  { %563 = vmatpush1.msra.mxu0 %v365_v15 }
  0xe1   :  { %v221_v42 = vpop.permute.xlu1 %220  ;;  %v192_v43 = vpop.permute.xlu0 %191 }
  0xe2   :  { %v195_v45 = vsel %vm175_vm4, %v190_v37, %v192_v43  ;;  %v363_v23 = vld [vmem:[#allocation2 + $0x38] sm:$0xff] }
  0xe3   :  { %201 = vst [vmem:[#allocation2 + $0x78] sm:$0xf] %v195_v45  ;;  %492 = vmatpush1.msra.mxu1 %v363_v23 }
  0xe5   :  { %v225_v46 = vpop.permute.xlu1 %224  ;;  %v223_v47 = vpop.permute.xlu0 %222 }
  0xe6   :  { %v228_v49 = vsel %vm210_vm5, %v221_v42, %v223_v47  ;;  %v229_v50 = vsel %vm210_vm5, %v223_v47, %v225_v46 }
  0xe7   :  { %234 = vst [vmem:[#allocation2 + $0x40] sm:$0xf0] %v228_v49  ;;  %235 = vst [vmem:[#allocation2 + $0x8] sm:$0xf0] %v229_v50 }
  0xe9   :  { %v174_v51 = vpop.permute.xlu1 %173  ;;  %v227_v52 = vpop.permute.xlu0 %226 }
  0xea   :  { %v178_v53 = vsel %vm175_vm4, %v905_v32, %v174_v51  ;;  %v230_v54 = vsel %vm210_vm5, %v225_v46, %v227_v52 }
  0xeb   :  { %184 = vst [vmem:[#allocation2 + $0x70] sm:$0xf] %v178_v53  ;;  %236 = vst [vmem:[#allocation2 + $0x78] sm:$0xf0] %v230_v54 }
  0xed   :  { %v116_v55 = vpop.permute.xlu1 %115  ;;  %v209_v57 = vpop.permute.xlu0 %208 }
  0xee   :  { %v213_v58 = vsel %vm210_vm5, %v909_v36, %v209_v57  ;;  %v358_v59 = vld [vmem:[#allocation2 + $0x40] sm:$0xff]  ;;  %v359_v32 = vld [vmem:[#allocation2 + $0x8] sm:$0xff] }
  0xef   :  { %219 = vst [vmem:[#allocation2 + $0x70] sm:$0xf0] %v213_v58  ;;  %493 = vmatprep.subr.mxu1 %v358_v59 }
  0xf1   :  { %v120_v60 = vpop.permute.xlu1 %119  ;;  %v118_v61 = vpop.permute.xlu0 %117 }
  0xf2   :  { %v123_v62 = vsel %vm104_vm6, %v116_v55, %v118_v61  ;;  %v124_v63 = vsel %vm104_vm6, %v118_v61, %v120_v60  ;;  %v360_v0 = vld [vmem:[#allocation2 + $0x78] sm:$0xff] }
  0xf3   :  { %129 = vst [vmem:[#allocation2 + $0x88] sm:$0xf] %v123_v62  ;;  %130 = vst [vmem:[#allocation2 + $0xe8] sm:$0xf] %v124_v63  ;;  %564 = vmatprep.subr.mxu0 %v360_v0 }
  0xf4   :  { %565 = vmatpush1.msra.mxu0 %v359_v32 }
  0xf5   :  { %v151_v1 = vpop.permute.xlu1 %150  ;;  %v122_v2 = vpop.permute.xlu0 %121 }
  0xf6   :  { %v125_v3 = vsel %vm104_vm6, %v120_v60, %v122_v2  ;;  %v357_v36 = vld [vmem:[#allocation2 + $0x70] sm:$0xff] }
  0xf7   :  { %131 = vst [vmem:[#allocation2 + $0xb8] sm:$0xf] %v125_v3  ;;  %494 = vmatpush1.msra.mxu1 %v357_v36 }
  0xf9   :  { %v155_v4 = vpop.permute.xlu1 %154  ;;  %v153_v5 = vpop.permute.xlu0 %152 }
  0xfa   :  { %v158_v7 = vsel %vm140_vm7, %v151_v1, %v153_v5  ;;  %v159_v8 = vsel %vm140_vm7, %v153_v5, %v155_v4 }
  0xfb   :  { %164 = vst [vmem:[#allocation2 + $0x88] sm:$0xf0] %v158_v7  ;;  %165 = vst [vmem:[#allocation2 + $0xe8] sm:$0xf0] %v159_v8 }
  0xfd   :  { %v103_v10 = vpop.permute.xlu1 %102  ;;  %v157_v11 = vpop.permute.xlu0 %156 }
  0xfe   :  { %v107_v12 = vsel %vm104_vm6, %v915_v44, %v103_v10  ;;  %v160_v14 = vsel %vm140_vm7, %v155_v4, %v157_v11 }
  0xff   :  { %113 = vst [vmem:[#allocation2 + $0x80] sm:$0xf] %v107_v12  ;;  %166 = vst [vmem:[#allocation2 + $0xb8] sm:$0xf0] %v160_v14 }
 0x101   :  { %v79_v16 = vpop.permute.xlu1 %78  ;;  %v139_v17 = vpop.permute.xlu0 %138 }
 0x102   :  { %v143_v18 = vsel %vm140_vm7, %v919_v48, %v139_v17  ;;  %v352_v19 = vld [vmem:[#allocation2 + $0x88] sm:$0xff] }
 0x103   :  { %149 = vst [vmem:[#allocation2 + $0x80] sm:$0xf0] %v143_v18  ;;  %495 = vmatprep.subr.mxu1 %v352_v19  ;;  %v353_v44 = vld [vmem:[#allocation2 + $0xe8] sm:$0xff] }
 0x105   :  { %v83_v13 = vpop.permute.xlu1 %82  ;;  %v81_v20 = vpop.permute.xlu0 %80 }
 0x106   :  { %v86_v9 = vsel %vm66_vm8, %v79_v16, %v81_v20  ;;  %v87_v21 = vsel %vm66_vm8, %v81_v20, %v83_v13  ;;  %v354_v22 = vld [vmem:[#allocation2 + $0xb8] sm:$0xff] }
 0x107   :  { %92 = vst [vmem:[#allocation2 + $0x18] sm:$0xf0] %v86_v9  ;;  %93 = vst [vmem:[#allocation2 + $0x50] sm:$0xf0] %v87_v21  ;;  %566 = vmatprep.subr.mxu0 %v354_v22 }
 0x108   :  { %567 = vmatpush1.msra.mxu0 %v353_v44 }
 0x109   :  { %v65_v24 = vpop.permute.xlu1 %64  ;;  %v85_v25 = vpop.permute.xlu0 %84 }
 0x10a   :  { %v69_v48 = vsel %vm66_vm8, %v925_v56, %v65_v24  ;;  %v88_v26 = vsel %vm66_vm8, %v83_v13, %v85_v25  ;;  %v351_v27 = vld [vmem:[#allocation2 + $0x80] sm:$0xff] }
 0x10b   :  { %75 = vst [vmem:[#allocation2 + $0xd8] sm:$0xf0] %v69_v48  ;;  %94 = vst [vmem:[#allocation2 + $0x68] sm:$0xf0] %v88_v26  ;;  %496 = vmatpush1.msra.mxu1 %v351_v27 }
 0x10e   :  { %v346_v28 = vld [vmem:[#allocation2 + $0x18] sm:$0xff]  ;;  %v347_v31 = vld [vmem:[#allocation2 + $0x50] sm:$0xff] }
 0x10f   :  { %497 = vmatprep.subr.mxu1 %v346_v28 }
 0x112   :  { %v345_v29 = vld [vmem:[#allocation2 + $0xd8] sm:$0xff]  ;;  %v348_v30 = vld [vmem:[#allocation2 + $0x68] sm:$0xff] }
 0x113   :  { %498 = vmatpush1.msra.mxu1 %v345_v29  ;;  %568 = vmatprep.subr.mxu0 %v348_v30 }
 0x114   :  { %639 = vmatmul.mubr.msk.f32.vlgmr.msra.gmra.mxu1 %vm373_vm9, %v933_v6  ;;  %569 = vmatpush1.msra.mxu0 %v347_v31 }
 0x115   :  { %642 = vmatmul.mubr.msk.f32.vlgmr.msra.gmra.mxu0 %vm373_vm9, %v933_v6 }
 0x185   :  { %v462_v56 = vpop.f32.mrf.mxu0 }
 0x186   :  { %609 = vst [vmem:[#allocation8] sm:$0xff] %v462_v56 }
 0x187   :  { %v464_v33 = vpop.f32.mrf.mxu0 }
 0x188   :  { %610 = vst [vmem:[#allocation8 + $0x8] sm:$0xff] %v464_v33 }
 0x1d4   :  { %v533_v34 = vpop.f32.mrf.mxu1 }
 0x1d5   :  { %611 = vst [vmem:[#allocation8 + $0x10] sm:$0xff] %v533_v34  ;;  %v604_v35 = vpop.f32.mrf.mxu0 }
 0x1d6   :  { %614 = vst [vmem:[#allocation8 + $0x20] sm:$0xff] %v604_v35  ;;  %v535_v37 = vpop.f32.mrf.mxu1 }
 0x1d7   :  { %613 = vst [vmem:[#allocation8 + $0x18] sm:$0xff] %v535_v37  ;;  %v606_v38 = vpop.f32.mrf.mxu0 }
 0x1d8   :  { %615 = vst [vmem:[#allocation8 + $0x28] sm:$0xff] %v606_v38 }
 0x1d9   :  { %718 = shalt.err (!%p715_p0)
}
 0x1da   :  { %s747_s30 = smov 384   ;;  %s748_s3 = smov 24  }
 0x1db   :  { %627 = dma.vmem_to_hbm [thread:$0]  %s622_s28, 768, %s988_s2, [#allocation5], %s747_s30, %s747_s30, %s748_s3  }
 0x1dc   :  { %731 = dma.done.wait [#allocation5], 768  }
 0x1dd   :  { %732 = vsyncadd [#allocation5], 4294966528 }
 0x1de   :  { %631 = vsyncpa [#allocation4], 1 }
 0x1df   :  { %632 = vsyncpa [#allocation7], 1 }
 0x1e0   :  { %633 = vsyncpa [#allocation5], 1 }

</bundles_post_ra>
